<compile_context>
chip_gen: v7x
topology: tpu7x:2x2x1
jax: 0.10.0
libtpu: 0.0.40
codegen_flags: <defaults>
</compile_context>

<pallas_src>
import jax
import jax.numpy as jnp
from jax.experimental import pallas as pl
from jax.experimental.pallas import tpu as pltpu

HIDDEN = 50
NUM_CLASSES = 10

_LANE = 128      # lane width / MXU tile edge
_SUBLANE = 8     # f32 sublane count
_TILE_B_CAP = 1024


def _round_up(x, m):
    return ((x + m - 1) // m) * m


def _cdiv(a, b):
    return (a + b - 1) // b


def _choose_batch_tiling(B):
    """Pick (tile_B, B_pad, grid) with bounded padding waste and >=2 grid
    steps for non-tiny batches (so v7x can shard across its two TCs)."""
    B8 = _round_up(B, _SUBLANE)
    if B8 <= _SUBLANE:
        return B8, B8, 1
    n_tiles = max(2, _cdiv(B8, _TILE_B_CAP))
    tile_B = _round_up(_cdiv(B8, n_tiles), _SUBLANE)
    B_pad = _round_up(B8, tile_B)
    return tile_B, B_pad, B_pad // tile_B


def _mlp_kernel(x_ref, w1_ref, b1_ref, w2_ref, b2_ref, out_ref):
    """Fused 2-layer MLP on one batch tile.

    x_ref:  [tile_B, D_in]   f32   (cast to bf16 in-kernel; VALU has slack)
    w1_ref: [D_in, H_pad]    bf16  (hidden zero-padded to 128)
    b1_ref: [1, H_pad]       f32   (zero-padded)
    w2_ref: [H_pad, C]       bf16  (zero-padded rows contribute nothing)
    b2_ref: [1, C]           f32
    out_ref:[tile_B, C]      f32
    """
    x = x_ref[...].astype(jnp.bfloat16)
    # fc1 on the MXU (bf16 inputs, f32 accumulation); bias + ReLU on VPU.
    h = jnp.dot(x, w1_ref[...], preferred_element_type=jnp.float32)
    h = jnp.maximum(h + b1_ref[...], 0.0)
    # fc2 on the MXU (K = H_pad = 128, aligned).
    o = jnp.dot(h.astype(jnp.bfloat16), w2_ref[...],
                preferred_element_type=jnp.float32)
    out_ref[...] = (o + b2_ref[...]).astype(out_ref.dtype)


def prepare_params(w1, b1, w2, b2):
    """One-time pad/cast of the parameters (hoisted out of the forward path)."""
    D_in, H = w1.shape
    C = w2.shape[1]
    H_pad = _round_up(H, _LANE)
    w1_p = jnp.zeros((D_in, H_pad), jnp.bfloat16).at[:, :H].set(
        w1.astype(jnp.bfloat16))
    b1_p = jnp.zeros((1, H_pad), jnp.float32).at[0, :H].set(
        b1.astype(jnp.float32))
    w2_p = jnp.zeros((H_pad, C), jnp.bfloat16).at[:H, :].set(
        w2.astype(jnp.bfloat16))
    b2_p = b2.astype(jnp.float32).reshape(1, C)
    return w1_p, b1_p, w2_p, b2_p


def nn_forward_prepared(x, params):
    """x: [B, D_in] f32, params from prepare_params(). Returns [B, C] f32."""
    w1_p, b1_p, w2_p, b2_p = params
    B, D_in = x.shape
    H_pad = w1_p.shape[1]
    C = w2_p.shape[1]

    tile_B, B_pad, grid_b = _choose_batch_tiling(B)

    # Only pad the batch rows (small, and a no-op for nicely shaped batches).
    if B_pad != B:
        x = jnp.zeros((B_pad, D_in), x.dtype).at[:B, :].set(x)

    out = pl.pallas_call(
        _mlp_kernel,
        out_shape=jax.ShapeDtypeStruct((B_pad, C), jnp.float32),
        grid_spec=pl.GridSpec(
            grid=(grid_b,),
            in_specs=[
                # x is tiled over the batch grid axis; last dim == full dim.
                pl.BlockSpec((tile_B, D_in), lambda i: (i, 0)),
                # Weights / biases: constant index_map -> resident in VMEM.
                pl.BlockSpec((D_in, H_pad), lambda i: (0, 0)),
                pl.BlockSpec((1, H_pad), lambda i: (0, 0)),
                pl.BlockSpec((H_pad, C), lambda i: (0, 0)),
                pl.BlockSpec((1, C), lambda i: (0, 0)),
            ],
            # Narrow output (C lanes, masked stores) -> minimal write stream.
            out_specs=pl.BlockSpec((tile_B, C), lambda i: (i, 0)),
        ),
        compiler_params=pltpu.CompilerParams(
            dimension_semantics=("parallel",),
        ),
    )(x, w1_p, b1_p, w2_p, b2_p)

    return out if B_pad == B else out[:B]


def nn_forward(x, w1, b1, w2, b2):
    """Convenience wrapper matching NN.forward: relu(x @ w1 + b1) @ w2 + b2."""
    return nn_forward_prepared(x, prepare_params(w1, b1, w2, b2))


def init_params(key, input_size, hidden, num_classes):
    """Deterministic init mimicking torch.nn.Linear default (+-1/sqrt(fan_in)).

    Returns weights already transposed to [in, out]."""
    k1, k2, k3, k4 = jax.random.split(key, 4)
    lim1 = 1.0 / jnp.sqrt(input_size)
    lim2 = 1.0 / jnp.sqrt(hidden)
    w1 = jax.random.uniform(k1, (input_size, hidden), jnp.float32, -lim1, lim1)
    b1 = jax.random.uniform(k2, (hidden,), jnp.float32, -lim1, lim1)
    w2 = jax.random.uniform(k3, (hidden, num_classes), jnp.float32, -lim2, lim2)
    b2 = jax.random.uniform(k4, (num_classes,), jnp.float32, -lim2, lim2)
    return w1, b1, w2, b2


if __name__ == "__main__":
    key = jax.random.PRNGKey(0)
    kx, kp = jax.random.split(key)

    batch = 8
    input_size = 32

    x = jax.random.normal(kx, (batch, input_size), jnp.float32)
    w1, b1, w2, b2 = init_params(kp, input_size, HIDDEN, NUM_CLASSES)

    params = prepare_params(w1, b1, w2, b2)      # one-time pad/cast
    out = nn_forward_prepared(x, params)
    out = jax.block_until_ready(out)

    # Reference in plain JAX with the same bf16 matmul-input quantization
    # (f32 accumulation), matching the kernel's numerics.
    xb = x.astype(jnp.bfloat16).astype(jnp.float32)
    w1b = w1.astype(jnp.bfloat16).astype(jnp.float32)
    w2b = w2.astype(jnp.bfloat16).astype(jnp.float32)
    h_ref = jnp.maximum(xb @ w1b + b1, 0.0)
    ref = h_ref.astype(jnp.bfloat16).astype(jnp.float32) @ w2b + b2

    # Looser check against the pure-f32 torch-equivalent math.
    # NOTE: bf16 matmul inputs (f32 accumulation) -> numerics differ slightly
    # from a pure f32 PyTorch forward; error grows with contraction length.
    ref_f32 = jnp.maximum(x @ w1 + b1, 0.0) @ w2 + b2

    assert out.shape == (batch, NUM_CLASSES)
    assert jnp.allclose(out, ref, atol=2e-3, rtol=2e-3)
    assert jnp.allclose(out, ref_f32, atol=5e-2, rtol=5e-2)

    print("KERNEL_OK")
</pallas_src>

<mosaic_0001>
module attributes {stable_mosaic.version = 11 : i64} {
  func.func @_mlp_kernel(%arg0: i32, %arg1: memref<8x32xf32, #tpu.memory_space<vmem>>, %arg2: memref<32x128xbf16, #tpu.memory_space<vmem>>, %arg3: memref<1x128xf32, #tpu.memory_space<vmem>>, %arg4: memref<128x10xbf16, #tpu.memory_space<vmem>>, %arg5: memref<1x10xf32, #tpu.memory_space<vmem>>, %arg6: memref<8x10xf32, #tpu.memory_space<vmem>>) attributes {dimension_semantics = [#tpu.dimension_semantics<parallel>], iteration_bounds = array<i64: 1>, scalar_prefetch = 0 : i64, scratch_operands = 0 : i64, tpu.core_type = #tpu.core_type<tc>, window_params = [{transform_indices = @transform_0, window_bounds = array<i64: 8, 32>}, {pipeline_mode = #tpu.pipeline_mode<synchronous>, transform_indices = @transform_1, window_bounds = array<i64: 32, 128>}, {pipeline_mode = #tpu.pipeline_mode<synchronous>, transform_indices = @transform_2, window_bounds = array<i64: 1, 128>}, {pipeline_mode = #tpu.pipeline_mode<synchronous>, transform_indices = @transform_3, window_bounds = array<i64: 128, 10>}, {pipeline_mode = #tpu.pipeline_mode<synchronous>, transform_indices = @transform_4, window_bounds = array<i64: 1, 10>}, {transform_indices = @transform_5, window_bounds = array<i64: 8, 10>}]} {
    %c0 = arith.constant 0 : index
    %c0_0 = arith.constant 0 : index
    %0 = vector.load %arg1[%c0, %c0_0] : memref<8x32xf32, #tpu.memory_space<vmem>>, vector<8x32xf32>
    %1 = arith.truncf %0 : vector<8x32xf32> to vector<8x32xbf16>
    %c0_1 = arith.constant 0 : index
    %c0_2 = arith.constant 0 : index
    %2 = vector.load %arg2[%c0_1, %c0_2] : memref<32x128xbf16, #tpu.memory_space<vmem>>, vector<32x128xbf16>
    %cst = arith.constant dense<0.000000e+00> : vector<8x128xf32>
    %3 = tpu.matmul %1, %2, %cst {dimension_numbers = #tpu.dot_dimension_numbers<[1], [0], [0], [1], [0, 0, 1, 1], [], []>} : vector<8x32xbf16>, vector<32x128xbf16>, vector<8x128xf32> -> vector<8x128xf32>
    %c0_3 = arith.constant 0 : index
    %c0_4 = arith.constant 0 : index
    %4 = vector.load %arg3[%c0_3, %c0_4] : memref<1x128xf32, #tpu.memory_space<vmem>>, vector<1x128xf32>
    %5 = vector.broadcast %4 : vector<1x128xf32> to vector<8x128xf32>
    %6 = arith.addf %3, %5 : vector<8x128xf32>
    %cst_5 = arith.constant 0.000000e+00 : f32
    %7 = vector.broadcast %cst_5 : f32 to vector<8x128xf32>
    %8 = arith.maximumf %6, %7 : vector<8x128xf32>
    %9 = arith.truncf %8 : vector<8x128xf32> to vector<8x128xbf16>
    %c0_6 = arith.constant 0 : index
    %c0_7 = arith.constant 0 : index
    %10 = vector.load %arg4[%c0_6, %c0_7] : memref<128x10xbf16, #tpu.memory_space<vmem>>, vector<128x10xbf16>
    %cst_8 = arith.constant dense<0.000000e+00> : vector<8x10xf32>
    %11 = tpu.matmul %9, %10, %cst_8 {dimension_numbers = #tpu.dot_dimension_numbers<[1], [0], [0], [1], [0, 0, 1, 1], [], []>} : vector<8x128xbf16>, vector<128x10xbf16>, vector<8x10xf32> -> vector<8x10xf32>
    %c0_9 = arith.constant 0 : index
    %c0_10 = arith.constant 0 : index
    %12 = vector.load %arg5[%c0_9, %c0_10] : memref<1x10xf32, #tpu.memory_space<vmem>>, vector<1x10xf32>
    %13 = vector.broadcast %12 : vector<1x10xf32> to vector<8x10xf32>
    %14 = arith.addf %11, %13 : vector<8x10xf32>
    %c0_11 = arith.constant 0 : index
    %c0_12 = arith.constant 0 : index
    %15 = vector.load %arg6[%c0_11, %c0_12] : memref<8x10xf32, #tpu.memory_space<vmem>>, vector<8x10xf32>
    tpu.vector_store %arg6[%c0_11, %c0_12], %14 {strides = array<i32>} : memref<8x10xf32, #tpu.memory_space<vmem>>, vector<8x10xf32>,
    return
  }
  func.func @transform_0(%arg0: i32) -> (i32, i32) {
    %c0_i32 = arith.constant 0 : i32
    %c0_i32_0 = arith.constant 0 : i32
    return %arg0, %c0_i32 : i32, i32
  }
  func.func @transform_1(%arg0: i32) -> (i32, i32) {
    %c0_i32 = arith.constant 0 : i32
    %c0_i32_0 = arith.constant 0 : i32
    %c0_i32_1 = arith.constant 0 : i32
    return %c0_i32, %c0_i32_0 : i32, i32
  }
  func.func @transform_2(%arg0: i32) -> (i32, i32) {
    %c0_i32 = arith.constant 0 : i32
    %c0_i32_0 = arith.constant 0 : i32
    %c0_i32_1 = arith.constant 0 : i32
    return %c0_i32, %c0_i32_0 : i32, i32
  }
  func.func @transform_3(%arg0: i32) -> (i32, i32) {
    %c0_i32 = arith.constant 0 : i32
    %c0_i32_0 = arith.constant 0 : i32
    %c0_i32_1 = arith.constant 0 : i32
    return %c0_i32, %c0_i32_0 : i32, i32
  }
  func.func @transform_4(%arg0: i32) -> (i32, i32) {
    %c0_i32 = arith.constant 0 : i32
    %c0_i32_0 = arith.constant 0 : i32
    %c0_i32_1 = arith.constant 0 : i32
    return %c0_i32, %c0_i32_0 : i32, i32
  }
  func.func @transform_5(%arg0: i32) -> (i32, i32) {
    %c0_i32 = arith.constant 0 : i32
    %c0_i32_0 = arith.constant 0 : i32
    return %arg0, %c0_i32 : i32, i32
  }
}

</mosaic_0001>

<bundles_post_ra>
// kernel: tpu_custom_call.1
= control target key start
LH: loop header
LB: loop body
LE: loop exit
PB: predicated region body
PF: predicated region fallthrough
CT: control target
= control target key end

     0   :  { %v310_v1 = vmov 0.0   ;;  %vm311_vm0 = vmmov 0   ;;  %vm47_vm1 = vcmask 261120   ;;  %s394_s0 = inlined_call_operand.vmem [shape: f32[8,32], index: 0, kind: input, shape index: {}]   ;;  %s395_s1 = inlined_call_operand.vmem [shape: bf16[32,128], index: 1, kind: input, shape index: {}]   ;;  %s396_s2 = inlined_call_operand.vmem [shape: f32[1,128], index: 2, kind: input, shape index: {}]   ;;  %s397_s3 = inlined_call_operand.vmem [shape: bf16[128,10], index: 3, kind: input, shape index: {}]   ;;  %s398_s4 = inlined_call_operand.vmem [shape: f32[1,10], index: 4, kind: input, shape index: {}]   ;;  %s399_s5 = inlined_call_operand.hbm [shape: f32[8,10], index: 5, kind: output, shape index: {}]  }
   0x1   :  { %v276_v0 = vld [vmem:[%s395_s1] sm:$0xff]   ;;  %245 = vmatprep.subr.bf16.mxu0 %v310_v1  ;;  %v277_v2 = vld [vmem:[%s395_s1 + $0x8] sm:$0xff]   ;;  %253 = vmatprep.subr.bf16.mxu1 %v310_v1  ;;  %v280_v7 = vld [vmem:[%s397_s3 + $0x10] sm:$0xff]  }
   0x2   :  { %246 = vmatpush3.bf16.msra.mxu0 %v276_v0  ;;  %249 = vmatprep.mubr.msk.bf16.mxu0 %vm311_vm0, %v310_v1  ;;  %v22_v3 = vld [vmem:[%s394_s0] sm:$0xff]  ;;  %v279_v6 = vld [vmem:[%s397_s3 + $0x8] sm:$0xff]  }
   0x3   :  { %247 = vmatprep.subr.bf16.mxu0 %v310_v1  ;;  %v278_v4 = vld [vmem:[%s397_s3] sm:$0xff]   ;;  %269 = vmatprep.mubr.msk.bf16.mxu1 %vm311_vm0, %v310_v1  ;;  %v23_v5 = vpack.c.bf16 %v22_v3, %v22_v3 }
   0x4   :  { %254 = vmatpush3.bf16.msra.mxu1 %v278_v4 }
   0x5   :  { %255 = vmatprep.subr.bf16.mxu1 %v310_v1 }
   0x6   :  { %248 = vmatpush3.bf16.msra.mxu0 %v277_v2 }
   0x8   :  { %256 = vmatpush3.bf16.msra.mxu1 %v279_v6 }
   0x9   :  { %250 = vmatmul.mubr.msk.bf16.vlgmr.msra.gmra.mrb[0].mxu0 %vm47_vm1, %v23_v5  ;;  %257 = vmatprep.subr.bf16.mxu1 %v310_v1 }
   0xa   :  { %10 = vsyncpa [#allocation3], 0  ;;  %v281_v8 = vld [vmem:[%s397_s3 + $0x18] sm:$0xff]   ;;  %v282_v9 = vld [vmem:[%s397_s3 + $0x20] sm:$0xff]   ;;  %s312_s17 = smov [#allocation2]   ;;  %vm204_vm2 = vcmask 80896  }
   0xb   :  { %v283_v10 = vld [vmem:[%s397_s3 + $0x28] sm:$0xff]   ;;  %v284_v11 = vld [vmem:[%s397_s3 + $0x30] sm:$0xff]   ;;  %v285_v12 = vld [vmem:[%s397_s3 + $0x38] sm:$0xff]   ;;  %s212_s18 = sshll.u32 %s312_s17, 4  ;;  %s213_s18 = int_to_ptr.vmem [resolvable:$true] %s212_s18 }
   0xc   :  { %258 = vmatpush3.bf16.msra.mxu1 %v280_v7  ;;  %v220_v13 = vld [vmem:[%s396_s2] ss:$0 sm:$0xff]  ;;  %s286_s2 = scalar_lea.vmem %s213_s18, 128  ;;  %p291_p1 = scmp.lt.s32.totalorder %s213_s18, %s213_s18 }
   0xd   :  { %259 = vmatprep.subr.bf16.mxu1 %v310_v1  ;;  %v224_v21 = vld [vmem:[%s398_s4] ss:$0 sm:$0xff]  ;;  %p287_p0 = scmp.ne.s32.totalorder %s213_s18, %s286_s2  ;;  %p292_p2 = scmp.lt.s32.totalorder %s286_s2, %s286_s2 }
   0xf   :  { %p293_p3 = por %p292_p2, %p291_p1 }
  0x10   :  { %260 = vmatpush3.bf16.msra.mxu1 %v281_v8 }
  0x11   :  { %261 = vmatprep.subr.bf16.mxu1 %v310_v1  ;;  %p294_p4 = pnand %p293_p3, %p287_p0 }
  0x14   :  { %262 = vmatpush3.bf16.msra.mxu1 %v282_v9 }
  0x15   :  { %263 = vmatprep.subr.bf16.mxu1 %v310_v1 }
  0x18   :  { %264 = vmatpush3.bf16.msra.mxu1 %v283_v10 }
  0x19   :  { %265 = vmatprep.subr.bf16.mxu1 %v310_v1 }
  0x1c   :  { %266 = vmatpush3.bf16.msra.mxu1 %v284_v11 }
  0x1d   :  { %267 = vmatprep.subr.bf16.mxu1 %v310_v1 }
  0x20   :  { %268 = vmatpush3.bf16.msra.mxu1 %v285_v12 }
  0xdc   :  { %v85_v14 = vpop.f32.mrb[0].mxu0 }
  0xdd   :  { %v86_v15 = vadd.f32 %v220_v13, %v85_v14  ;;  %v251_v16 = vpop.f32.mrb[1].mxu0 }
  0xde   :  { %v88_v17 = vpop.f32.mrb[2].mxu0 }
  0xdf   :  { %v91_v18 = vmax.f32 %v86_v15, 0.0  ;;  %v252_v19 = vpop.f32.mrb[3].mxu0 }
  0xe1   :  { %v92_v20 = vpack.c.bf16 %v91_v18, %v91_v18 }
  0xe3   :  { %270 = vmatmul.mubr.bf16.vlgmr.msra.gmra.mrb[0].mxu1 %v92_v20 }
 0x1b6   :  { %v198_v22 = vpop.f32.mrb[0].mxu1 }
 0x1b7   :  { %v199_v23 = vadd.f32 %v224_v21, %v198_v22  ;;  %v271_v24 = vpop.f32.mrb[1].mxu1 }
 0x1b8   :  { %v201_v25 = vpop.f32.mrb[2].mxu1 }
 0x1b9   :  { %v272_v26 = vpop.f32.mrb[3].mxu1  ;;  %205 = vst.msk [vmem:[#allocation2] sm:$0xff] %vm204_vm2, %v199_v23 }
 0x1ba   :  { %297 = shalt.err (!%p294_p4)
}
 0x1bb   :  { %s298_s4 = scalar_lea.hbm %s399_s5, 128 }
 0x1bc   :  { %p299_p5 = scmp.ne.s32.totalorder %s399_s5, %s298_s4  ;;  %p302_p6 = scmp.lt.u32.totalorder %s298_s4, %s399_s5 }
 0x1be   :  { %p304_p7 = pnand %p302_p6, %p299_p5 }
 0x1c0   :  { %307 = shalt.err (!%p304_p7)
}
 0x1c1   :  { %215 = dma.vmem_to_hbm [thread:$0]  %s213_s18, 128, %s399_s5, [#allocation3]  }
 0x1c2   :  { %308 = dma.done.wait [#allocation3], 128  }
 0x1c3   :  { %309 = vsyncadd [#allocation3], 4294967168 }
 0x1c4   :  { %219 = vsyncpa [#allocation3], 1 }

</bundles_post_ra>
